<compile_context>
chip_gen: v6e
topology: v6e:2x2x1
jax: 0.10.0
libtpu: 0.0.40
codegen_flags: <defaults>
</compile_context>

<pallas_src>
import functools
import math

import jax
import jax.numpy as jnp
from jax import lax
from jax.experimental import pallas as pl
from jax.experimental.pallas import tpu as pltpu


def _round_up(x, m):
    return ((x + m - 1) // m) * m


# ---------------------------------------------------------------------------
# Fast path: VMEM-resident table, gather-as-one-hot-matmul (MXU).
# ---------------------------------------------------------------------------
def _resident_kernel(ids_ref, table_ref, out_ref, *, scale):
    # ids_ref  : VMEM (bt, 1)        int32 token ids for this block
    # table_ref: VMEM (v_pad, d_pad) whole (padded) embedding table, resident
    # out_ref  : VMEM (bt, d_pad)    output tile (lane-dense)
    bt = out_ref.shape[0]
    v_pad = table_ref.shape[0]
    ids = ids_ref[...]                                        # (bt, 1) int32
    iota = lax.broadcasted_iota(jnp.int32, (bt, v_pad), 1)    # (bt, v_pad)
    onehot = (ids == iota).astype(table_ref.dtype)            # exact selection
    acc = jnp.dot(onehot, table_ref[...], preferred_element_type=jnp.float32)
    out_ref[...] = (acc * scale).astype(out_ref.dtype)


def _embed_resident(flat_ids, table, *, bt, scale, out_dtype):
    m_pad = flat_ids.shape[0]
    vocab, d_model = table.shape
    v_pad = _round_up(vocab, 8)
    d_pad = _round_up(d_model, 128)
    if (v_pad, d_pad) != (vocab, d_model):
        table = jnp.pad(table, ((0, v_pad - vocab), (0, d_pad - d_model)))
    n_blocks = m_pad // bt
    ids2d = flat_ids.reshape(m_pad, 1)

    out_itemsize = jnp.dtype(out_dtype).itemsize
    table_bytes = v_pad * d_pad * table.dtype.itemsize
    # table (double-buffered by the pipeline) + out double buffer + ids + slack
    vmem_needed = 2 * table_bytes + 2 * bt * d_pad * out_itemsize + 4 * bt * 4
    vmem_limit = int(min(64 << 20, max(2 * vmem_needed, 16 << 20)))

    out = pl.pallas_call(
        functools.partial(_resident_kernel, scale=scale),
        out_shape=jax.ShapeDtypeStruct((m_pad, d_pad), out_dtype),
        grid_spec=pl.GridSpec(
            grid=(n_blocks,),
            in_specs=[
                pl.BlockSpec((bt, 1), lambda i: (i, 0)),
                # Constant block index -> the table is DMA'd once and reused.
                pl.BlockSpec((v_pad, d_pad), lambda i: (0, 0)),
            ],
            out_specs=pl.BlockSpec((bt, d_pad), lambda i: (i, 0)),
        ),
        compiler_params=pltpu.CompilerParams(
            dimension_semantics=("parallel",),
            vmem_limit_bytes=vmem_limit,
        ),
    )(ids2d, table)
    return out[:, :d_model]


# ---------------------------------------------------------------------------
# Fallback path: table in HBM, manual double-buffered row-gather DMAs.
# ---------------------------------------------------------------------------
def _make_gather_kernel(bt, scale):
    def kernel(ids_ref, table_ref, out_ref, buf, sem):
        # ids_ref  : SMEM (m_pad,) int32      -- scalar-prefetched token ids
        # table_ref: HBM  (vocab, d_model)    -- raw ref, manual DMA gather
        # out_ref  : VMEM (bt, d_model)       -- output tile for block i
        # buf      : VMEM (2*bt, d_model)     -- two gather slots [0:bt), [bt:2bt)
        # sem      : DMA semaphores, one per slot
        i = pl.program_id(0)
        nb = pl.num_programs(0)

        def issue_block(block_idx, slot):
            base = block_idx * bt
            off = slot * bt

            def body(t, carry):
                tok = ids_ref[base + t]
                pltpu.make_async_copy(
                    table_ref.at[pl.ds(tok, 1)],
                    buf.at[pl.ds(off + t, 1)],
                    sem.at[slot],
                ).start()
                return carry

            # Unrolled issue loop: descriptor pushes are the serial cost here.
            lax.fori_loop(0, bt, body, 0, unroll=8)

        # Prime slot 0 with block 0 on the first step.
        @pl.when(i == 0)
        def _():
            issue_block(0, 0)

        # Prefetch next block into the other slot (ids are already in SMEM).
        @pl.when(i + 1 < nb)
        def _():
            issue_block(i + 1, (i + 1) % 2)

        # One aggregated wait for the whole block: the per-row copies all
        # signal sem[slot]; a single wait descriptor with the same total byte
        # count (bt rows of d_model) consumes them at once.
        slot = i % 2
        off = pl.multiple_of(slot * bt, 8)
        pltpu.make_async_copy(
            table_ref.at[pl.ds(0, bt)],
            buf.at[pl.ds(off, bt)],
            sem.at[slot],
        ).wait()

        rows = buf[pl.ds(off, bt), :]
        out_ref[...] = (rows.astype(jnp.float32) * scale).astype(out_ref.dtype)

    return kernel


def _embed_hbm_gather(flat_ids, table, *, bt, scale, out_dtype):
    m_pad = flat_ids.shape[0]
    vocab, d_model = table.shape
    n_blocks = m_pad // bt

    buf_bytes = 2 * bt * d_model * table.dtype.itemsize
    out_bytes = 2 * bt * d_model * jnp.dtype(out_dtype).itemsize
    vmem_limit = int(min(64 << 20, max(2 * (buf_bytes + out_bytes), 16 << 20)))

    return pl.pallas_call(
        _make_gather_kernel(bt, scale),
        out_shape=jax.ShapeDtypeStruct((m_pad, d_model), out_dtype),
        grid_spec=pltpu.PrefetchScalarGridSpec(
            num_scalar_prefetch=1,
            grid=(n_blocks,),
            in_specs=[pl.BlockSpec(memory_space=pl.ANY)],  # table stays in HBM
            out_specs=pl.BlockSpec((bt, d_model), lambda i, ids: (i, 0)),
            scratch_shapes=[
                pltpu.VMEM((2 * bt, d_model), table.dtype),
                pltpu.SemaphoreType.DMA((2,)),
            ],
        ),
        compiler_params=pltpu.CompilerParams(
            # Slot/prefetch state is carried across grid steps -> sequential.
            dimension_semantics=("arbitrary",),
            vmem_limit_bytes=vmem_limit,
        ),
    )(flat_ids, table)


# ---------------------------------------------------------------------------
# Public wrapper (matches InputEmbeddings.forward semantics).
# ---------------------------------------------------------------------------
def input_embeddings(ids, table, *, block_tokens=128, out_dtype=None,
                     vmem_table_bytes=4 << 20, force_hbm_gather=False):
    """table[ids] * sqrt(d_model).

    ids:   (...,) integer token ids in [0, vocab)
    table: (vocab, d_model) embedding weights
    returns (..., d_model)
    """
    vocab, d_model = table.shape
    scale = float(math.sqrt(d_model))
    out_dtype = table.dtype if out_dtype is None else jnp.dtype(out_dtype)

    lead = ids.shape
    flat = ids.reshape(-1).astype(jnp.int32)
    flat = jnp.clip(flat, 0, vocab - 1)  # guard against OOB row DMAs
    m = flat.shape[0]

    # Path selection: small padded tables live in VMEM.
    v_pad = _round_up(vocab, 8)
    d_pad = _round_up(d_model, 128)
    table_bytes_padded = v_pad * d_pad * table.dtype.itemsize
    use_resident = (not force_hbm_gather) and table_bytes_padded <= vmem_table_bytes

    # Block size: multiple of 8 sublanes; keep the HBM-path working set within
    # ~20 MiB (v7x has 64 MiB VMEM / 32 MiB default scoped); ensure >=2 blocks
    # for short sequences so a parallel grid can use both v7x TensorCores.
    bt = max(8, (int(block_tokens) // 8) * 8)
    if not use_resident:
        per_tok = d_model * (table.dtype.itemsize + jnp.dtype(out_dtype).itemsize)
        while bt > 8 and 2 * bt * per_tok > (20 << 20):
            bt //= 2
        bt = max(8, (bt // 8) * 8)
    if m > 8 and pl.cdiv(m, bt) < 2:
        bt = max(8, _round_up(pl.cdiv(m, 2), 8))

    n_blocks = pl.cdiv(m, bt)
    m_pad = n_blocks * bt
    if m_pad != m:
        flat = jnp.pad(flat, (0, m_pad - m))  # pad with token 0 (valid row)

    # NOTE: for very long sequences the flat id array should be fed per-block
    # (SMEM window) or the call chunked, instead of scalar-prefetching all ids.
    if use_resident:
        out = _embed_resident(flat, table, bt=bt, scale=scale, out_dtype=out_dtype)
    else:
        out = _embed_hbm_gather(flat, table, bt=bt, scale=scale, out_dtype=out_dtype)

    return out[:m].reshape(*lead, d_model)


if __name__ == "__main__":
    # Shapes implied by the module: (batch, seq) int ids -> (batch, seq, d_model)
    batch, seq, d_model, vocab = 2, 8, 32, 128

    key = jax.random.PRNGKey(0)
    k_ids, k_emb = jax.random.split(key, 2)

    # nn.Embedding default init: N(0, 1)
    table = jax.random.normal(k_emb, (vocab, d_model), jnp.float32)
    ids = jax.random.randint(k_ids, (batch, seq), 0, vocab, dtype=jnp.int32)

    # 1) VMEM-resident fast path (default for this small table).
    out = jax.block_until_ready(input_embeddings(ids, table))
    ref = jnp.take(table, ids, axis=0) * math.sqrt(d_model)
    assert out.shape == (batch, seq, d_model)
    assert out.dtype == table.dtype
    assert jnp.allclose(out, ref, atol=1e-5, rtol=1e-5), "resident path mismatch"

    # 2) HBM manual-gather path (forced; exercises the double-buffered DMA path).
    vocab2, d2, seq2 = 512, 256, 24
    k_ids2, k_emb2 = jax.random.split(jax.random.PRNGKey(1))
    table2 = jax.random.normal(k_emb2, (vocab2, d2), jnp.float32)
    ids2 = jax.random.randint(k_ids2, (batch, seq2), 0, vocab2, dtype=jnp.int32)
    out2 = jax.block_until_ready(
        input_embeddings(ids2, table2, force_hbm_gather=True)
    )
    ref2 = jnp.take(table2, ids2, axis=0) * math.sqrt(d2)
    assert out2.shape == (batch, seq2, d2)
    assert jnp.allclose(out2, ref2, atol=1e-5, rtol=1e-5), "gather path mismatch"

    print("KERNEL_OK")
</pallas_src>

<mosaic_0001>
module attributes {stable_mosaic.version = 11 : i64} {
  func.func @_resident_kernel(%arg0: i32, %arg1: memref<8x1xi32, #tpu.memory_space<vmem>>, %arg2: memref<128x128xf32, #tpu.memory_space<vmem>>, %arg3: memref<8x128xf32, #tpu.memory_space<vmem>>) attributes {dimension_semantics = [#tpu.dimension_semantics<parallel>], iteration_bounds = array<i64: 2>, scalar_prefetch = 0 : i64, scratch_operands = 0 : i64, tpu.core_type = #tpu.core_type<tc>, window_params = [{transform_indices = @transform_0, window_bounds = array<i64: 8, 1>}, {pipeline_mode = #tpu.pipeline_mode<synchronous>, transform_indices = @transform_1, window_bounds = array<i64: 128, 128>}, {transform_indices = @transform_2, window_bounds = array<i64: 8, 128>}]} {
    %c0 = arith.constant 0 : index
    %c0_0 = arith.constant 0 : index
    %0 = vector.load %arg1[%c0, %c0_0] : memref<8x1xi32, #tpu.memory_space<vmem>>, vector<8x1xi32>
    %1 = tpu.iota {dimensions = array<i32: 1>} : vector<8x128xi32>
    %2 = vector.broadcast %0 : vector<8x1xi32> to vector<8x128xi32>
    %3 = arith.cmpi eq, %2, %1 : vector<8x128xi32>
    %4 = arith.extui %3 : vector<8x128xi1> to vector<8x128xi32>
    %5 = arith.sitofp %4 : vector<8x128xi32> to vector<8x128xf32>
    %c0_1 = arith.constant 0 : index
    %c0_2 = arith.constant 0 : index
    %6 = vector.load %arg2[%c0_1, %c0_2] : memref<128x128xf32, #tpu.memory_space<vmem>>, vector<128x128xf32>
    %cst = arith.constant dense<0.000000e+00> : vector<8x128xf32>
    %7 = tpu.matmul %5, %6, %cst {dimension_numbers = #tpu.dot_dimension_numbers<[1], [0], [0], [1], [0, 0, 1, 1], [], []>} : vector<8x128xf32>, vector<128x128xf32>, vector<8x128xf32> -> vector<8x128xf32>
    %cst_3 = arith.constant 5.65685415 : f32
    %8 = vector.broadcast %cst_3 : f32 to vector<8x128xf32>
    %9 = arith.mulf %7, %8 : vector<8x128xf32>
    %c0_4 = arith.constant 0 : index
    %c0_5 = arith.constant 0 : index
    %10 = vector.load %arg3[%c0_4, %c0_5] : memref<8x128xf32, #tpu.memory_space<vmem>>, vector<8x128xf32>
    tpu.vector_store %arg3[%c0_4, %c0_5], %9 {strides = array<i32>} : memref<8x128xf32, #tpu.memory_space<vmem>>, vector<8x128xf32>,
    return
  }
  func.func @transform_0(%arg0: i32) -> (i32, i32) {
    %c0_i32 = arith.constant 0 : i32
    %c0_i32_0 = arith.constant 0 : i32
    return %arg0, %c0_i32 : i32, i32
  }
  func.func @transform_1(%arg0: i32) -> (i32, i32) {
    %c0_i32 = arith.constant 0 : i32
    %c0_i32_0 = arith.constant 0 : i32
    %c0_i32_1 = arith.constant 0 : i32
    return %c0_i32, %c0_i32_0 : i32, i32
  }
  func.func @transform_2(%arg0: i32) -> (i32, i32) {
    %c0_i32 = arith.constant 0 : i32
    %c0_i32_0 = arith.constant 0 : i32
    return %arg0, %c0_i32 : i32, i32
  }
}

</mosaic_0001>

<bundles_post_ra>
// kernel: tpu_custom_call.1
= control target key start
LH: loop header
LB: loop body
LE: loop exit
PB: predicated region body
PF: predicated region fallthrough
CT: control target
= control target key end

     0   :  { %7 = vsyncpa [#allocation3], 0  ;;  %s685_s0 = inlined_call_operand.vmem [shape: s32[16,1], index: 0, kind: input, shape index: {}]   ;;  %s686_s1 = inlined_call_operand.hbm [shape: f32[128,128], index: 1, kind: input, shape index: {}]   ;;  %s687_s2 = inlined_call_operand.hbm [shape: f32[16,128], index: 2, kind: output, shape index: {}]  }
   0x1   :  { %8 = vsyncpa [#allocation4], 0 }
   0x2   :  { %10 = vsyncpa [#allocation4 + $0x1], 0  ;;  %s574_s9 = smov 0   ;;  %s576_s10 = smov 0  }
   0x3   :  { %s578_s11 = smov 0   ;;  %s580_s12 = smov 0  }
   0x4 LB: > { %s595_s13 = sadd.s32 4294967295, %s549_s12   ;;  %s336_s14 = sadd.s32 4294967294, %s549_s12   ;;  %s549_s12 = sphi %s580_s12, %s695_s12   ;;  %s545_s11 = sphi %s578_s11, %s694_s11   ;;  %s541_s10 = sphi %s576_s10, %s693_s10   ;;  %s537_s9 = sphi %s574_s9, %s692_s9  }
   0x5   : > { %s599_s15 = sadd.s32 1, %s549_s12   ;;  %s70_s16 = sadd.s32 1, %s545_s11 }
   0x6   : > { %s67_s17 = ssub.s32 %s549_s12, %s599_s15  ;;  %p80_p0 = scmp.ne.s32.totalorder %s545_s11, %s541_s10 }
   0x7   : > { %p68_p1 = scmp.eq.s32.totalorder %s67_s17, 0  ;;  %p81_p2 = scmp.eq.s32.totalorder %s595_s13, 1 }
   0x8   : > { %p86_p3 = scmp.ne.s32.totalorder %s541_s10, %s537_s9  ;;  %p87_p4 = scmp.eq.s32.totalorder %s336_s14, 1 }
   0x9   : > { %s610_s18 = scalar_select %p68_p1, %s545_s11, %s70_s16  }
   0xa   : > { %p612_p5 = por %p81_p2, %p80_p0  ;;  %p616_p6 = por %p87_p4, %p86_p3 }
   0xb   : > { %p337_p7 = scmp.ge.s32.totalorder %s549_s12, 1  ;;  %p94_p8 = scmp.lt.s32.totalorder %s549_s12, 3 }
   0xc   : > { %s689_s20 = scalar_select %p616_p6, 1, 0 }
   0xd   : > { %p416_p9 = scmp.eq.s32.totalorder %s595_s13, 0  ;;  %p623_p10 = pnand %p337_p7, %p94_p8 }
   0xe   : > { %s551_s22 = smov [#allocation2]  }
   0xf   : > { %s106_s23 = sshll.u32 %s551_s22, 4  ;;  %p408_p11 = pneg %p623_p10  ;;  %s107_s23 = int_to_ptr.vmem [resolvable:$true] %s106_s23 }
  0x10   : > { %s470_s24 = scalar_lea.vmem %s107_s23, 2048  ;;  %p478_p3 = scmp.lt.s32.totalorder %s107_s23, %s107_s23 }
  0x11   : > { %p409_p12 = pnand %p416_p9, %p408_p11  ;;  %p471_p0 = scmp.ne.s32.totalorder %s107_s23, %s470_s24 }
  0x12   : > { %p479_p4 = scmp.lt.s32.totalorder %s470_s24, %s470_s24 }
  0x13   : > { %p461_p13 = pneg %p409_p12 }
  0x14   : > { %p480_p6 = por %p479_p4, %p478_p3 }
  0x15   : > { %p473_p1 = pnand %p471_p0, %p461_p13 }
  0x17   : > { %p474_p2 = pneg %p473_p1 }
  0x19   : > { %p481_p7 = pnand %p480_p6, %p474_p2 }
  0x1b   : > { %484 = shalt.err (!%p481_p7)
}
  0x1c   : > { %s552_s25 = smov 128   ;;  %s553_s26 = smov 8  }
  0x1d   : > { %411 = dma.hbm_to_vmem [thread:$0]  (!%p409_p12), %s686_s1, 2048, %s107_s23, [#allocation3], %s552_s25, %s552_s25, %s553_s26  }
  0x1e   : > { %129 = sbr.rel (%p623_p10) target bundleno = 376 (0x178), region = 28 }
  0x23   : > { %528 = dma.done.wait (%p416_p9), [#allocation3], 2048  }
  0x24   : > { %530 = vsyncadd (%p416_p9), [#allocation3], 4294965248  ;;  %p150_p8 = scmp.lt.s32.totalorder %s595_s13, 1  ;;  %v554_v0 = vmov 0   ;;  %v555_v1 = vmov 0.0   ;;  %vm556_vm0 = vmmov 0   ;;  %v155_v19 = vlaneseq }
  0x25   : > { %458 = vset.pattern.permute.xlu0 %v554_v0  ;;  %367 = vmatprep.subr.mxu0 %v555_v1  ;;  %v178_v3 = vld [vmem:[#allocation2 + $0x78] sm:$0xff]  ;;  %v177_v4 = vld [vmem:[#allocation2 + $0x70] sm:$0xff]  ;;  %v176_v5 = vld [vmem:[#allocation2 + $0x68] sm:$0xff]  ;;  %v557_v22 = vmov 1.0   ;;  %s147_s6 = sand.u32 1, %s541_s10   ;;  %s347_s8 = sshll.u32 %s595_s13, 7 }
  0x26   : > { %s151_s29 = scalar_select %p150_p8, %s595_s13, 1  ;;  %399 = vmatprep.mubr.msk.f32.mxu0 %vm556_vm0, %v555_v1  ;;  %368 = vmatpush3.msra.mxu0 %v178_v3  ;;  %v175_v6 = vld [vmem:[#allocation2 + $0x60] sm:$0xff]  ;;  %v174_v7 = vld [vmem:[#allocation2 + $0x58] sm:$0xff]  ;;  %v173_v8 = vld [vmem:[#allocation2 + $0x50] sm:$0xff]  ;;  %v156_v20 = vand.u32 127, %v155_v19 }
  0x27   : > { %369 = vmatprep.subr.mxu0 %v555_v1  ;;  %v172_v9 = vld [vmem:[#allocation2 + $0x48] sm:$0xff]  ;;  %v171_v10 = vld [vmem:[#allocation2 + $0x40] sm:$0xff]  ;;  %v170_v11 = vld [vmem:[#allocation2 + $0x38] sm:$0xff]  ;;  %s342_s7 = sshll.u32 %s147_s6, 3  ;;  %s650_s22 = scalar_lea.hbm %s687_s2, %s347_s8 }
  0x28   : > { %s343_s30 = sshll.u32 %s151_s29, 3  ;;  %370 = vmatpush3.msra.mxu0 %v177_v4  ;;  %v169_v12 = vld [vmem:[#allocation2 + $0x30] sm:$0xff]  ;;  %v168_v13 = vld [vmem:[#allocation2 + $0x28] sm:$0xff]  ;;  %v167_v14 = vld [vmem:[#allocation2 + $0x20] sm:$0xff]  ;;  %s149_s14 = scalar_lea.vmem [#allocation5], %s342_s7 }
  0x29   : > { %s153_s5 = scalar_lea.vmem %s685_s0, %s343_s30  ;;  %371 = vmatprep.subr.mxu0 %v555_v1  ;;  %v166_v15 = vld [vmem:[#allocation2 + $0x18] sm:$0xff]  ;;  %v165_v16 = vld [vmem:[#allocation2 + $0x10] sm:$0xff]  ;;  %v164_v17 = vld [vmem:[#allocation2 + $0x8] sm:$0xff]  ;;  %s265_s16 = sshll.u32 %s149_s14, 4  ;;  %s266_s16 = int_to_ptr.vmem [resolvable:$true] %s265_s16 }
  0x2a   : > { %v154_v2 = vld [vmem:[%s153_s5] sm:$0xff]  ;;  %372 = vmatpush3.msra.mxu0 %v176_v5  ;;  %s252_s23 = scalar_lea.sflag [#allocation4], %s147_s6  ;;  %s485_s24 = scalar_lea.vmem %s266_s16, 128 }
  0x2b   : > { %158 = vperm.xlu0 %458, %v154_v2   ;;  %373 = vmatprep.subr.mxu0 %v555_v1  ;;  %v163_v18 = vld [vmem:[#allocation2] sm:$0xff]  ;;  %p486_p6 = scmp.ne.s32.totalorder %s266_s16, %s485_s24  ;;  %s558_s25 = smov [#allocation5]  }
  0x2c   : > { %374 = vmatpush3.msra.mxu0 %v175_v6  ;;  %s489_s13 = sshll.u32 %s558_s25, 4  ;;  %s490_s13 = int_to_ptr.vmem [resolvable:$false] %s489_s13 }
  0x2d   : > { %375 = vmatprep.subr.mxu0 %v555_v1  ;;  %p487_p9 = pnand %p486_p6, %p612_p5  ;;  %s491_s26 = scalar_lea.vmem %s490_s13, 256 }
  0x2e   : > { %376 = vmatpush3.msra.mxu0 %v174_v7  ;;  %p492_p11 = scmp.lt.s32.totalorder %s266_s16, %s490_s13  ;;  %p493_p12 = scmp.lt.s32.totalorder %s491_s26, %s485_s24 }
  0x2f   : > { %377 = vmatprep.subr.mxu0 %v555_v1  ;;  %p488_p10 = pneg %p487_p9 }
  0x30   : > { %378 = vmatpush3.msra.mxu0 %v173_v8  ;;  %p494_p13 = por %p493_p12, %p492_p11 }
  0x31   : > { %379 = vmatprep.subr.mxu0 %v555_v1 }
  0x32   : > { %380 = vmatpush3.msra.mxu0 %v172_v9  ;;  %p495_p0 = pnand %p494_p13, %p488_p10 }
  0x33   : > { %381 = vmatprep.subr.mxu0 %v555_v1 }
  0x34   : > { %382 = vmatpush3.msra.mxu0 %v171_v10 }
  0x35   : > { %383 = vmatprep.subr.mxu0 %v555_v1 }
  0x36   : > { %384 = vmatpush3.msra.mxu0 %v170_v11 }
  0x37   : > { %385 = vmatprep.subr.mxu0 %v555_v1 }
  0x38   : > { %386 = vmatpush3.msra.mxu0 %v169_v12 }
  0x39   : > { %387 = vmatprep.subr.mxu0 %v555_v1 }
  0x3a   : > { %388 = vmatpush3.msra.mxu0 %v168_v13 }
  0x3b   : > { %389 = vmatprep.subr.mxu0 %v555_v1 }
  0x3c   : > { %390 = vmatpush3.msra.mxu0 %v167_v14 }
  0x3d   : > { %391 = vmatprep.subr.mxu0 %v555_v1 }
  0x3e   : > { %392 = vmatpush3.msra.mxu0 %v166_v15 }
  0x3f   : > { %393 = vmatprep.subr.mxu0 %v555_v1 }
  0x40   : > { %394 = vmatpush3.msra.mxu0 %v165_v16 }
  0x41   : > { %395 = vmatprep.subr.mxu0 %v555_v1 }
  0x42   : > { %396 = vmatpush3.msra.mxu0 %v164_v17 }
  0x43   : > { %397 = vmatprep.subr.mxu0 %v555_v1 }
  0x44   : > { %398 = vmatpush3.msra.mxu0 %v163_v18 }
  0xa6   : > { %v159_v21 = vpop.permute.xlu0 %158 }
  0xa7   : > { %vm160_vm1 = vcmp.eq.s32.totalorder %v159_v21, %v156_v20 }
  0xa8   : > { %400 = vmatmul.mubr.msk.f32.vlgmr.msra.gmra.mxu0 %vm160_vm1, %v557_v22 }
 0x168   : > { %v245_v23 = vpop.f32.mrf.mxu0 }
 0x169   : > { %v249_v24 = vmul.f32 5.656854, %v245_v23 }
 0x16a   : > { %v401_v25 = vpop.f32.mrf.mxu0 }
 0x16b   : > { %250 = vst [vmem:[%s149_s14] sm:$0xff] %v249_v24 }
 0x16c   : > { %498 = shalt.err (!%p495_p0)
}
 0x16d   : > { %s499_s27 = scalar_lea.hbm %s650_s22, 128  ;;  %s503_s30 = scalar_lea.hbm %s687_s2, 256 }
 0x16e   : > { %p500_p1 = scmp.ne.s32.totalorder %s650_s22, %s499_s27  ;;  %p504_p4 = scmp.lt.s32.totalorder %s650_s22, %s687_s2 }
 0x16f   : > { %p505_p7 = scmp.lt.s32.totalorder %s503_s30, %s499_s27 }
 0x170   : > { %p501_p2 = pnand %p500_p1, %p612_p5 }
 0x171   : > { %p506_p8 = por %p505_p7, %p504_p4 }
 0x172   : > { %p502_p3 = pneg %p501_p2 }
 0x174   : > { %p507_p6 = pnand %p506_p8, %p502_p3 }
 0x176   : > { %510 = shalt.err (!%p507_p6)
}
 0x177   : > { %406 = dma.vmem_to_hbm [thread:$0]  (%p612_p5), %s266_s16, 128, %s650_s22, %s252_s23  }
 0x178 PF: > { %p418_p9 = scmp.ge.s32.totalorder %s549_s12, 2  ;;  %s277_s5 = sand.u32 1, %s537_s9  }
 0x179   : > { %p691_p10 = scmp.ne.s32.totalorder %s689_s20, 0  ;;  %s278_s6 = scalar_lea.sflag [#allocation4], %s277_s5 }
 0x17b   : > { %p413_p11 = pnand %p418_p9, %p691_p10 }
 0x17d   : > { %p414_p12 = pneg %p413_p11 }
 0x17f   : > { %532 = dma.done.wait (%p414_p12), %s278_s6, 128  }
 0x180   : > { %534 = vsyncadd (%p414_p12), %s278_s6, 4294967168  ;;  %p13_p13 = scmp.ge.s32.totalorder %s599_s15, 4   ;;  %s692_s9 = smov %s541_s10 }
 0x181   : > { %s693_s10 = smov %s545_s11  ;;  %s694_s11 = smov %s610_s18 }
 0x182   : > { %s695_s12 = smov %s599_s15  ;;  %15 = sbr.rel (!%p13_p13) target bundleno = 4 (0x4), region = 68 }
 0x187   :  { %283 = vsyncpa [#allocation3], 1 }
 0x188   :  { %285 = vsyncpa [#allocation3 + $0x1], 1 }
 0x189   :  { %286 = vsyncpa [#allocation4], 1 }
 0x18a   :  { %288 = vsyncpa [#allocation4 + $0x1], 1 }

</bundles_post_ra>
